<compile_context>
chip_gen: v7x
topology: tpu7x:2x2x1
jax: 0.10.0
libtpu: 0.0.40
codegen_flags: <defaults>
</compile_context>

<pallas_src>
import functools

import jax
import jax.numpy as jnp
from jax.experimental import pallas as pl
from jax.experimental.pallas import tpu as pltpu

EPS = 1e-5


def _resblock_kernel(alpha_ref,                       # SMEM (2,): [prelu1_a, prelu2_a]
                     x_ref,                           # VMEM (1, 3, C_in, T_OUT_TILE)
                     w1d_ref,                         # (C_out or 2*C_out, C_in)
                     w2_ref,                          # (C_out, C_out)
                     s1_ref, b1_ref, s2_ref, b2_ref,  # (C_out, 1) folded BN scale/shift
                     o_ref,                           # VMEM (1, C_out, T_OUT_TILE)
                     *, has_downsample, c_out):
    a1 = alpha_ref[0]
    a2 = alpha_ref[1]
    s1 = s1_ref[...]
    b1 = b1_ref[...]
    s2 = s2_ref[...]
    b2 = b2_ref[...]
    w1d = w1d_ref[...]
    w2 = w2_ref[...]

    pooled = None
    for j in range(3):                     # static unroll over the 3 pool phases
        x = x_ref[0, j]                    # (C_in, T_OUT_TILE) -- time on lanes

        # conv1 (+ fused downsample conv when present): one MXU matmul, K = C_in.
        hw = jnp.dot(w1d, x, preferred_element_type=jnp.float32)
        h = hw[:c_out]
        if has_downsample:
            res = hw[c_out:]
        else:
            res = x.astype(jnp.float32)    # nn.Identity() downsample: no matmul

        # BN1 (folded, eval mode) + PReLU1
        h = h * s1 + b1
        h = jnp.where(h > 0, h, a1 * h)

        # conv2 + BN2
        h = jnp.dot(w2, h.astype(w2.dtype), preferred_element_type=jnp.float32)
        h = h * s2 + b2

        # residual add + PReLU2
        y = h + res
        y = jnp.where(y > 0, y, a2 * y)

        # MaxPool1d(3) == elementwise max over the 3 phase slabs
        pooled = y if pooled is None else jnp.maximum(pooled, y)

    o_ref[0] = pooled


def resblock_forward(x_nct, params, *, t_out_tile=None, matmul_dtype=jnp.float32):
    """x_nct: (B, C_in, T) float32 (PyTorch NCT layout). Returns (B, C_out, T//3)."""
    B, C_in, T = x_nct.shape
    C_out = params["w1"].shape[1]
    T_out = T // 3                                     # MaxPool1d(3): floor, tail dropped
    assert T_out >= 1, "MaxPool1d(3) needs T >= 3"
    T_used = T_out * 3

    # ---- fold eval-mode BatchNorm into per-channel scale / shift -------------
    s1 = params["bn1_gamma"] * jax.lax.rsqrt(params["bn1_var"] + EPS)
    b1 = params["bn1_beta"] - params["bn1_mean"] * s1
    s2 = params["bn2_gamma"] * jax.lax.rsqrt(params["bn2_var"] + EPS)
    b2 = params["bn2_beta"] - params["bn2_mean"] * s2
    s1, b1, s2, b2 = (a.reshape(C_out, 1).astype(jnp.float32)
                      for a in (s1, b1, s2, b2))

    alphas = jnp.array([params["prelu1_a"], params["prelu2_a"]], jnp.float32)

    # ---- weights as (C_out, C_in); fuse conv1 + downsample into one matmul ---
    has_downsample = params["wd"] is not None
    if not has_downsample:
        assert C_in == C_out, "identity downsample requires C_in == C_out"
    w1d = params["w1"].T
    if has_downsample:
        w1d = jnp.concatenate([w1d, params["wd"].T], axis=0)    # (2*C_out, C_in)
    w1d = w1d.astype(matmul_dtype)
    w2 = params["w2"].T.astype(matmul_dtype)                     # (C_out, C_out)

    # ---- tile the pooled-time axis (windows never straddle a tile) -----------
    if t_out_tile is None:
        t_out_tile = T_out if T_out <= 512 else 512
    if t_out_tile >= T_out:
        t_out_tile = T_out                      # single tile == full (padded) dim
    else:
        t_out_tile = max(128, (t_out_tile // 128) * 128)   # lane-aligned tiles
    num_t = pl.cdiv(T_out, t_out_tile)
    T_out_pad = num_t * t_out_tile

    # ---- regroup time into 3 pool phases: (B, 3, C_in, T_out_pad) ------------
    # Pre-pool ops are pointwise in time, so this single input regroup replaces
    # both NCT<->NTC wrapper transposes of the original implementation.
    x_ph = x_nct[:, :, :T_used].astype(matmul_dtype)
    x_ph = x_ph.reshape(B, C_in, T_out, 3).transpose(0, 3, 1, 2)
    if T_out_pad != T_out:
        x_ph = jnp.pad(x_ph, ((0, 0), (0, 0), (0, 0), (0, T_out_pad - T_out)))

    itemsize = jnp.dtype(matmul_dtype).itemsize
    block_bytes = (2 * 3 * C_in * t_out_tile * itemsize          # x double-buffer
                   + 2 * C_out * t_out_tile * 4                  # out double-buffer
                   + (w1d.size + w2.size) * itemsize             # resident weights
                   + 8 * C_out * t_out_tile * 4)                 # live f32 temporaries
    vmem_limit = int(min(48 * 1024 * 1024, max(8 * 1024 * 1024, 2 * block_bytes)))

    flops = (2 * B * 3 * T_out_pad * (w1d.shape[0] * C_in + C_out * C_out)
             + 10 * B * 3 * T_out_pad * C_out)
    bytes_accessed = (x_ph.size * itemsize + (w1d.size + w2.size) * itemsize
                      + 4 * C_out * 4 + B * C_out * T_out_pad * 4)
    cost = pl.CostEstimate(flops=int(flops), transcendentals=0,
                           bytes_accessed=int(bytes_accessed))

    kernel = functools.partial(_resblock_kernel,
                               has_downsample=has_downsample, c_out=C_out)

    out = pl.pallas_call(
        kernel,
        out_shape=jax.ShapeDtypeStruct((B, C_out, T_out_pad), jnp.float32),
        grid=(B, num_t),
        in_specs=[
            pl.BlockSpec(memory_space=pltpu.MemorySpace.SMEM),                   # alphas
            pl.BlockSpec((1, 3, C_in, t_out_tile), lambda b, t: (b, 0, 0, t)),   # x phases
            pl.BlockSpec(w1d.shape, lambda b, t: (0, 0)),                        # w1 (+wd)
            pl.BlockSpec((C_out, C_out), lambda b, t: (0, 0)),                   # w2
            pl.BlockSpec((C_out, 1), lambda b, t: (0, 0)),                       # s1
            pl.BlockSpec((C_out, 1), lambda b, t: (0, 0)),                       # b1
            pl.BlockSpec((C_out, 1), lambda b, t: (0, 0)),                       # s2
            pl.BlockSpec((C_out, 1), lambda b, t: (0, 0)),                       # b2
        ],
        out_specs=pl.BlockSpec((1, C_out, t_out_tile), lambda b, t: (b, 0, t)),
        compiler_params=pltpu.CompilerParams(
            dimension_semantics=("parallel", "parallel"),
            vmem_limit_bytes=vmem_limit),
        cost_estimate=cost,
    )(alphas, x_ph, w1d, w2, s1, b1, s2, b2)

    return out[:, :, :T_out] if T_out_pad != T_out else out     # (B, C_out, T_out), NCT


def resblock_reference(x_nct, params):
    """Pure-JAX reference (NCT layout) mirroring the PyTorch forward (eval-mode BN)."""
    C_out = params["w1"].shape[1]

    def conv1x1(x, w):                                # w: (C_in, C_out)
        return jnp.einsum("bct,cd->bdt", x, w)

    def bn(x, gamma, beta, mean, var):
        return ((x - mean[None, :, None]) / jnp.sqrt(var + EPS)[None, :, None]
                * gamma[None, :, None] + beta[None, :, None])

    def prelu(x, a):
        return jnp.where(x > 0, x, a * x)

    h = conv1x1(x_nct, params["w1"])
    h = bn(h, params["bn1_gamma"], params["bn1_beta"], params["bn1_mean"], params["bn1_var"])
    h = prelu(h, params["prelu1_a"])
    h = conv1x1(h, params["w2"])
    h = bn(h, params["bn2_gamma"], params["bn2_beta"], params["bn2_mean"], params["bn2_var"])
    res = x_nct if params["wd"] is None else conv1x1(x_nct, params["wd"])
    y = prelu(h + res, params["prelu2_a"])
    B, _, T = x_nct.shape
    T_out = T // 3
    y = y[:, :, :T_out * 3].reshape(B, C_out, T_out, 3).max(axis=-1)
    return y


def make_params(key, c_in, c_out):
    ks = jax.random.split(key, 8)
    return {
        "w1": jax.random.normal(ks[0], (c_in, c_out), jnp.float32) * 0.3,
        "w2": jax.random.normal(ks[1], (c_out, c_out), jnp.float32) * 0.3,
        "wd": (jax.random.normal(ks[2], (c_in, c_out), jnp.float32) * 0.3
               if c_in != c_out else None),
        "bn1_gamma": 1.0 + 0.1 * jax.random.normal(ks[3], (c_out,), jnp.float32),
        "bn1_beta": 0.1 * jax.random.normal(ks[4], (c_out,), jnp.float32),
        "bn1_mean": 0.1 * jax.random.normal(ks[5], (c_out,), jnp.float32),
        "bn1_var": jnp.abs(jax.random.normal(ks[6], (c_out,), jnp.float32)) + 0.5,
        "bn2_gamma": 1.0 + 0.1 * jax.random.normal(ks[7], (c_out,), jnp.float32),
        "bn2_beta": jnp.linspace(-0.1, 0.1, c_out, dtype=jnp.float32),
        "bn2_mean": jnp.linspace(-0.05, 0.05, c_out, dtype=jnp.float32),
        "bn2_var": jnp.linspace(0.6, 1.4, c_out, dtype=jnp.float32),
        "prelu1_a": 0.25,   # PyTorch PReLU default init
        "prelu2_a": 0.25,
    }


if __name__ == "__main__":
    key = jax.random.PRNGKey(0)

    tests = [
        # (B, C_in, C_out, T, t_out_tile)
        (2, 4, 8, 16, None),     # downsample-conv variant, single tile
        (2, 8, 8, 16, None),     # identity-downsample variant (no downsample matmul)
        (1, 8, 8, 800, 128),     # multi-tile path: 3 lane-aligned tiles + tail padding
    ]
    for i, (B, C_in, C_out, T, tile) in enumerate(tests):
        kx, kp, key = jax.random.split(key, 3)
        x = jax.random.normal(kx, (B, C_in, T), jnp.float32)
        params = make_params(kp, C_in, C_out)

        out = jax.block_until_ready(resblock_forward(x, params, t_out_tile=tile))
        ref = jax.block_until_ready(resblock_reference(x, params))

        assert out.shape == ref.shape == (B, C_out, T // 3), (i, out.shape, ref.shape)
        err = float(jnp.max(jnp.abs(out - ref)))
        assert jnp.allclose(out, ref, atol=1e-5, rtol=1e-5), f"test {i}: max abs err {err}"

    print("KERNEL_OK")
</pallas_src>

<mosaic_0001>
module attributes {stable_mosaic.version = 11 : i64} {
  func.func @_resblock_kernel(%arg0: i32, %arg1: i32, %arg2: memref<2xf32, #tpu.memory_space<smem>>, %arg3: memref<1x3x4x5xf32, #tpu.memory_space<vmem>>, %arg4: memref<16x4xf32, #tpu.memory_space<vmem>>, %arg5: memref<8x8xf32, #tpu.memory_space<vmem>>, %arg6: memref<8x1xf32, #tpu.memory_space<vmem>>, %arg7: memref<8x1xf32, #tpu.memory_space<vmem>>, %arg8: memref<8x1xf32, #tpu.memory_space<vmem>>, %arg9: memref<8x1xf32, #tpu.memory_space<vmem>>, %arg10: memref<1x8x5xf32, #tpu.memory_space<vmem>>) attributes {dimension_semantics = [#tpu.dimension_semantics<parallel>, #tpu.dimension_semantics<parallel>], iteration_bounds = array<i64: 2, 1>, scalar_prefetch = 0 : i64, scratch_operands = 0 : i64, tpu.core_type = #tpu.core_type<tc>, window_params = [{transform_indices = @transform_0, window_bounds = array<i64: 2>}, {transform_indices = @transform_1, window_bounds = array<i64: 1, 3, 4, 5>}, {pipeline_mode = #tpu.pipeline_mode<synchronous>, transform_indices = @transform_2, window_bounds = array<i64: 16, 4>}, {pipeline_mode = #tpu.pipeline_mode<synchronous>, transform_indices = @transform_3, window_bounds = array<i64: 8, 8>}, {pipeline_mode = #tpu.pipeline_mode<synchronous>, transform_indices = @transform_4, window_bounds = array<i64: 8, 1>}, {pipeline_mode = #tpu.pipeline_mode<synchronous>, transform_indices = @transform_5, window_bounds = array<i64: 8, 1>}, {pipeline_mode = #tpu.pipeline_mode<synchronous>, transform_indices = @transform_6, window_bounds = array<i64: 8, 1>}, {pipeline_mode = #tpu.pipeline_mode<synchronous>, transform_indices = @transform_7, window_bounds = array<i64: 8, 1>}, {transform_indices = @transform_8, window_bounds = array<i64: 1, 8, 5>}]} {
    %c0 = arith.constant 0 : index
    %0 = memref.load %arg2[%c0] : memref<2xf32, #tpu.memory_space<smem>>
    %c1 = arith.constant 1 : index
    %1 = memref.load %arg2[%c1] : memref<2xf32, #tpu.memory_space<smem>>
    %c0_0 = arith.constant 0 : index
    %c0_1 = arith.constant 0 : index
    %2 = vector.load %arg6[%c0_0, %c0_1] : memref<8x1xf32, #tpu.memory_space<vmem>>, vector<8x1xf32>
    %c0_2 = arith.constant 0 : index
    %c0_3 = arith.constant 0 : index
    %3 = vector.load %arg7[%c0_2, %c0_3] : memref<8x1xf32, #tpu.memory_space<vmem>>, vector<8x1xf32>
    %c0_4 = arith.constant 0 : index
    %c0_5 = arith.constant 0 : index
    %4 = vector.load %arg8[%c0_4, %c0_5] : memref<8x1xf32, #tpu.memory_space<vmem>>, vector<8x1xf32>
    %c0_6 = arith.constant 0 : index
    %c0_7 = arith.constant 0 : index
    %5 = vector.load %arg9[%c0_6, %c0_7] : memref<8x1xf32, #tpu.memory_space<vmem>>, vector<8x1xf32>
    %c0_8 = arith.constant 0 : index
    %c0_9 = arith.constant 0 : index
    %6 = vector.load %arg4[%c0_8, %c0_9] : memref<16x4xf32, #tpu.memory_space<vmem>>, vector<16x4xf32>
    %c0_10 = arith.constant 0 : index
    %c0_11 = arith.constant 0 : index
    %7 = vector.load %arg5[%c0_10, %c0_11] : memref<8x8xf32, #tpu.memory_space<vmem>>, vector<8x8xf32>
    %c0_12 = arith.constant 0 : index
    %c0_13 = arith.constant 0 : index
    %c0_14 = arith.constant 0 : index
    %c0_15 = arith.constant 0 : index
    %8 = vector.load %arg3[%c0_12, %c0_13, %c0_14, %c0_15] : memref<1x3x4x5xf32, #tpu.memory_space<vmem>>, vector<1x1x4x5xf32>
    %9 = vector.shape_cast %8 : vector<1x1x4x5xf32> to vector<4x5xf32>
    %cst = arith.constant dense<0.000000e+00> : vector<16x5xf32>
    %10 = tpu.matmul %6, %9, %cst {dimension_numbers = #tpu.dot_dimension_numbers<[1], [0], [0], [1], [0, 0, 1, 1], [], []>} : vector<16x4xf32>, vector<4x5xf32>, vector<16x5xf32> -> vector<16x5xf32>
    %11 = vector.extract_strided_slice %10 {offsets = [0, 0], sizes = [8, 5], strides = [1, 1]} : vector<16x5xf32> to vector<8x5xf32>
    %12 = vector.extract_strided_slice %10 {offsets = [8, 0], sizes = [8, 5], strides = [1, 1]} : vector<16x5xf32> to vector<8x5xf32>
    %13 = vector.broadcast %2 : vector<8x1xf32> to vector<8x5xf32>
    %14 = arith.mulf %11, %13 : vector<8x5xf32>
    %15 = vector.broadcast %3 : vector<8x1xf32> to vector<8x5xf32>
    %16 = arith.addf %14, %15 : vector<8x5xf32>
    %cst_16 = arith.constant 0.000000e+00 : f32
    %17 = vector.broadcast %cst_16 : f32 to vector<8x5xf32>
    %18 = arith.cmpf ogt, %16, %17 : vector<8x5xf32>
    %19 = vector.broadcast %0 : f32 to vector<8x5xf32>
    %20 = arith.mulf %19, %16 : vector<8x5xf32>
    %21 = arith.select %18, %16, %20 : vector<8x5xi1>, vector<8x5xf32>
    %cst_17 = arith.constant dense<0.000000e+00> : vector<8x5xf32>
    %22 = tpu.matmul %7, %21, %cst_17 {dimension_numbers = #tpu.dot_dimension_numbers<[1], [0], [0], [1], [0, 0, 1, 1], [], []>} : vector<8x8xf32>, vector<8x5xf32>, vector<8x5xf32> -> vector<8x5xf32>
    %23 = vector.broadcast %4 : vector<8x1xf32> to vector<8x5xf32>
    %24 = arith.mulf %22, %23 : vector<8x5xf32>
    %25 = vector.broadcast %5 : vector<8x1xf32> to vector<8x5xf32>
    %26 = arith.addf %24, %25 : vector<8x5xf32>
    %27 = arith.addf %26, %12 : vector<8x5xf32>
    %cst_18 = arith.constant 0.000000e+00 : f32
    %28 = vector.broadcast %cst_18 : f32 to vector<8x5xf32>
    %29 = arith.cmpf ogt, %27, %28 : vector<8x5xf32>
    %30 = vector.broadcast %1 : f32 to vector<8x5xf32>
    %31 = arith.mulf %30, %27 : vector<8x5xf32>
    %32 = arith.select %29, %27, %31 : vector<8x5xi1>, vector<8x5xf32>
    %c0_19 = arith.constant 0 : index
    %c1_20 = arith.constant 1 : index
    %c0_21 = arith.constant 0 : index
    %c0_22 = arith.constant 0 : index
    %33 = vector.load %arg3[%c0_19, %c1_20, %c0_21, %c0_22] : memref<1x3x4x5xf32, #tpu.memory_space<vmem>>, vector<1x1x4x5xf32>
    %34 = vector.shape_cast %33 : vector<1x1x4x5xf32> to vector<4x5xf32>
    %cst_23 = arith.constant dense<0.000000e+00> : vector<16x5xf32>
    %35 = tpu.matmul %6, %34, %cst_23 {dimension_numbers = #tpu.dot_dimension_numbers<[1], [0], [0], [1], [0, 0, 1, 1], [], []>} : vector<16x4xf32>, vector<4x5xf32>, vector<16x5xf32> -> vector<16x5xf32>
    %36 = vector.extract_strided_slice %35 {offsets = [0, 0], sizes = [8, 5], strides = [1, 1]} : vector<16x5xf32> to vector<8x5xf32>
    %37 = vector.extract_strided_slice %35 {offsets = [8, 0], sizes = [8, 5], strides = [1, 1]} : vector<16x5xf32> to vector<8x5xf32>
    %38 = vector.broadcast %2 : vector<8x1xf32> to vector<8x5xf32>
    %39 = arith.mulf %36, %38 : vector<8x5xf32>
    %40 = vector.broadcast %3 : vector<8x1xf32> to vector<8x5xf32>
    %41 = arith.addf %39, %40 : vector<8x5xf32>
    %cst_24 = arith.constant 0.000000e+00 : f32
    %42 = vector.broadcast %cst_24 : f32 to vector<8x5xf32>
    %43 = arith.cmpf ogt, %41, %42 : vector<8x5xf32>
    %44 = vector.broadcast %0 : f32 to vector<8x5xf32>
    %45 = arith.mulf %44, %41 : vector<8x5xf32>
    %46 = arith.select %43, %41, %45 : vector<8x5xi1>, vector<8x5xf32>
    %cst_25 = arith.constant dense<0.000000e+00> : vector<8x5xf32>
    %47 = tpu.matmul %7, %46, %cst_25 {dimension_numbers = #tpu.dot_dimension_numbers<[1], [0], [0], [1], [0, 0, 1, 1], [], []>} : vector<8x8xf32>, vector<8x5xf32>, vector<8x5xf32> -> vector<8x5xf32>
    %48 = vector.broadcast %4 : vector<8x1xf32> to vector<8x5xf32>
    %49 = arith.mulf %47, %48 : vector<8x5xf32>
    %50 = vector.broadcast %5 : vector<8x1xf32> to vector<8x5xf32>
    %51 = arith.addf %49, %50 : vector<8x5xf32>
    %52 = arith.addf %51, %37 : vector<8x5xf32>
    %cst_26 = arith.constant 0.000000e+00 : f32
    %53 = vector.broadcast %cst_26 : f32 to vector<8x5xf32>
    %54 = arith.cmpf ogt, %52, %53 : vector<8x5xf32>
    %55 = vector.broadcast %1 : f32 to vector<8x5xf32>
    %56 = arith.mulf %55, %52 : vector<8x5xf32>
    %57 = arith.select %54, %52, %56 : vector<8x5xi1>, vector<8x5xf32>
    %58 = arith.maximumf %32, %57 : vector<8x5xf32>
    %c0_27 = arith.constant 0 : index
    %c2 = arith.constant 2 : index
    %c0_28 = arith.constant 0 : index
    %c0_29 = arith.constant 0 : index
    %59 = vector.load %arg3[%c0_27, %c2, %c0_28, %c0_29] : memref<1x3x4x5xf32, #tpu.memory_space<vmem>>, vector<1x1x4x5xf32>
    %60 = vector.shape_cast %59 : vector<1x1x4x5xf32> to vector<4x5xf32>
    %cst_30 = arith.constant dense<0.000000e+00> : vector<16x5xf32>
    %61 = tpu.matmul %6, %60, %cst_30 {dimension_numbers = #tpu.dot_dimension_numbers<[1], [0], [0], [1], [0, 0, 1, 1], [], []>} : vector<16x4xf32>, vector<4x5xf32>, vector<16x5xf32> -> vector<16x5xf32>
    %62 = vector.extract_strided_slice %61 {offsets = [0, 0], sizes = [8, 5], strides = [1, 1]} : vector<16x5xf32> to vector<8x5xf32>
    %63 = vector.extract_strided_slice %61 {offsets = [8, 0], sizes = [8, 5], strides = [1, 1]} : vector<16x5xf32> to vector<8x5xf32>
    %64 = vector.broadcast %2 : vector<8x1xf32> to vector<8x5xf32>
    %65 = arith.mulf %62, %64 : vector<8x5xf32>
    %66 = vector.broadcast %3 : vector<8x1xf32> to vector<8x5xf32>
    %67 = arith.addf %65, %66 : vector<8x5xf32>
    %cst_31 = arith.constant 0.000000e+00 : f32
    %68 = vector.broadcast %cst_31 : f32 to vector<8x5xf32>
    %69 = arith.cmpf ogt, %67, %68 : vector<8x5xf32>
    %70 = vector.broadcast %0 : f32 to vector<8x5xf32>
    %71 = arith.mulf %70, %67 : vector<8x5xf32>
    %72 = arith.select %69, %67, %71 : vector<8x5xi1>, vector<8x5xf32>
    %cst_32 = arith.constant dense<0.000000e+00> : vector<8x5xf32>
    %73 = tpu.matmul %7, %72, %cst_32 {dimension_numbers = #tpu.dot_dimension_numbers<[1], [0], [0], [1], [0, 0, 1, 1], [], []>} : vector<8x8xf32>, vector<8x5xf32>, vector<8x5xf32> -> vector<8x5xf32>
    %74 = vector.broadcast %4 : vector<8x1xf32> to vector<8x5xf32>
    %75 = arith.mulf %73, %74 : vector<8x5xf32>
    %76 = vector.broadcast %5 : vector<8x1xf32> to vector<8x5xf32>
    %77 = arith.addf %75, %76 : vector<8x5xf32>
    %78 = arith.addf %77, %63 : vector<8x5xf32>
    %cst_33 = arith.constant 0.000000e+00 : f32
    %79 = vector.broadcast %cst_33 : f32 to vector<8x5xf32>
    %80 = arith.cmpf ogt, %78, %79 : vector<8x5xf32>
    %81 = vector.broadcast %1 : f32 to vector<8x5xf32>
    %82 = arith.mulf %81, %78 : vector<8x5xf32>
    %83 = arith.select %80, %78, %82 : vector<8x5xi1>, vector<8x5xf32>
    %84 = arith.maximumf %58, %83 : vector<8x5xf32>
    %c0_34 = arith.constant 0 : index
    %c0_35 = arith.constant 0 : index
    %c0_36 = arith.constant 0 : index
    %85 = vector.load %arg10[%c0_34, %c0_35, %c0_36] : memref<1x8x5xf32, #tpu.memory_space<vmem>>, vector<1x8x5xf32>
    %86 = vector.shape_cast %85 : vector<1x8x5xf32> to vector<8x5xf32>
    %87 = vector.shape_cast %84 : vector<8x5xf32> to vector<1x8x5xf32>
    tpu.vector_store %arg10[%c0_34, %c0_35, %c0_36], %87 {strides = array<i32>} : memref<1x8x5xf32, #tpu.memory_space<vmem>>, vector<1x8x5xf32>,
    return
  }
  func.func @transform_0(%arg0: i32, %arg1: i32) -> i32 {
    %c0_i32 = arith.constant 0 : i32
    %c0_i32_0 = arith.constant 0 : i32
    return %c0_i32 : i32
  }
  func.func @transform_1(%arg0: i32, %arg1: i32) -> (i32, i32, i32, i32) {
    %c0_i32 = arith.constant 0 : i32
    %c0_i32_0 = arith.constant 0 : i32
    %c0_i32_1 = arith.constant 0 : i32
    return %arg0, %c0_i32, %c0_i32_0, %arg1 : i32, i32, i32, i32
  }
  func.func @transform_2(%arg0: i32, %arg1: i32) -> (i32, i32) {
    %c0_i32 = arith.constant 0 : i32
    %c0_i32_0 = arith.constant 0 : i32
    %c0_i32_1 = arith.constant 0 : i32
    return %c0_i32, %c0_i32_0 : i32, i32
  }
  func.func @transform_3(%arg0: i32, %arg1: i32) -> (i32, i32) {
    %c0_i32 = arith.constant 0 : i32
    %c0_i32_0 = arith.constant 0 : i32
    %c0_i32_1 = arith.constant 0 : i32
    return %c0_i32, %c0_i32_0 : i32, i32
  }
  func.func @transform_4(%arg0: i32, %arg1: i32) -> (i32, i32) {
    %c0_i32 = arith.constant 0 : i32
    %c0_i32_0 = arith.constant 0 : i32
    %c0_i32_1 = arith.constant 0 : i32
    return %c0_i32, %c0_i32_0 : i32, i32
  }
  func.func @transform_5(%arg0: i32, %arg1: i32) -> (i32, i32) {
    %c0_i32 = arith.constant 0 : i32
    %c0_i32_0 = arith.constant 0 : i32
    %c0_i32_1 = arith.constant 0 : i32
    return %c0_i32, %c0_i32_0 : i32, i32
  }
  func.func @transform_6(%arg0: i32, %arg1: i32) -> (i32, i32) {
    %c0_i32 = arith.constant 0 : i32
    %c0_i32_0 = arith.constant 0 : i32
    %c0_i32_1 = arith.constant 0 : i32
    return %c0_i32, %c0_i32_0 : i32, i32
  }
  func.func @transform_7(%arg0: i32, %arg1: i32) -> (i32, i32) {
    %c0_i32 = arith.constant 0 : i32
    %c0_i32_0 = arith.constant 0 : i32
    %c0_i32_1 = arith.constant 0 : i32
    return %c0_i32, %c0_i32_0 : i32, i32
  }
  func.func @transform_8(%arg0: i32, %arg1: i32) -> (i32, i32, i32) {
    %c0_i32 = arith.constant 0 : i32
    %c0_i32_0 = arith.constant 0 : i32
    return %arg0, %c0_i32, %arg1 : i32, i32, i32
  }
}

</mosaic_0001>

<bundles_post_ra>
// kernel: tpu_custom_call.1
= control target key start
LH: loop header
LB: loop body
LE: loop exit
PB: predicated region body
PF: predicated region fallthrough
CT: control target
= control target key end

     0   :  { %13 = vsyncpa [#allocation3], 0  ;;  %s1172_s27 = smov 0   ;;  %s1174_s28 = smov 0   ;;  %s1268_s0 = inlined_call_operand.vmem [shape: f32[2], index: 0, kind: input, shape index: {}]   ;;  %s1269_s1 = inlined_call_operand.vmem [shape: f32[2,3,4,5], index: 1, kind: input, shape index: {}]   ;;  %s1270_s2 = inlined_call_operand.vmem [shape: f32[16,4], index: 2, kind: input, shape index: {}]   ;;  %s1271_s3 = inlined_call_operand.vmem [shape: f32[8,8], index: 3, kind: input, shape index: {}]   ;;  %s1272_s4 = inlined_call_operand.vmem [shape: f32[8,1], index: 4, kind: input, shape index: {}]   ;;  %s1273_s5 = inlined_call_operand.vmem [shape: f32[8,1], index: 5, kind: input, shape index: {}]   ;;  %s1274_s6 = inlined_call_operand.vmem [shape: f32[8,1], index: 6, kind: input, shape index: {}]   ;;  %s1275_s7 = inlined_call_operand.vmem [shape: f32[8,1], index: 7, kind: input, shape index: {}]   ;;  %s1276_s8 = inlined_call_operand.vmem [shape: f32[2,8,5], index: 8, kind: output, shape index: {}]  }
   0x1   :  { %s1176_s29 = smov 0  }
   0x2 LB: > { %s968_s30 = sadd.s32 4294967295, %s1121_s29   ;;  %s31_s9 = sadd.s32 1, %s1117_s28  ;;  %s1121_s29 = sphi %s1176_s29, %s19_s29   ;;  %s1117_s28 = sphi %s1174_s28, %s1280_s28   ;;  %s1113_s27 = sphi %s1172_s27, %s1279_s27  }
   0x3   : > { %p33_p0 = scmp.ge.s32.totalorder %s31_s9, 2  ;;  %p970_p1 = scmp.ge.s32.totalorder %s1121_s29, 1 }
   0x4   : > { %p239_p2 = scmp.lt.s32.totalorder %s1121_s29, 3  ;;  %p1197_p4 = scmp.eq.s32.totalorder %s968_s30, 0 }
   0x5   : > { %s1282_s9 = smov (%p33_p0, %s31_s9), 0  ;;  %s252_s14 = sshll.u32 %s1268_s0, 4  ;;  %s253_s14 = int_to_ptr.vmem [resolvable:$true] %s252_s14 }
   0x6   : > { %p1193_p3 = pnand %p970_p1, %p239_p2  ;;  %s1080_s15 = scalar_lea.vmem %s253_s14, 16 }
   0x7   : > { %p1081_p7 = scmp.ne.s32.totalorder %s253_s14, %s1080_s15  ;;  %p1088_p11 = scmp.lt.s32.totalorder %s253_s14, %s253_s14 }
   0x8   : > { %p1044_p5 = pneg %p1193_p3  ;;  %p1089_p12 = scmp.lt.s32.totalorder %s1080_s15, %s1080_s15 }
   0xa   : > { %p1045_p6 = pnand %p1197_p4, %p1044_p5  ;;  %p1090_p13 = por %p1089_p12, %p1088_p11 }
   0xc   : > { %p1082_p8 = pneg %p1045_p6 }
   0xe   : > { %p1083_p9 = pnand %p1082_p8, %p1081_p7 }
  0x10   : > { %p1084_p10 = pneg %p1083_p9 }
  0x12   : > { %p1091_p0 = pnand %p1090_p13, %p1084_p10 }
  0x14   : > { %1094 = shalt.err (!%p1091_p0)
}
  0x15   : > { %s1123_s16 = smov [#allocation2]   ;;  %294 = sbr.rel (%p1193_p3) target bundleno = 493 (0x1ed), region = 52 }
  0x16   : > { %1047 = dma.vmem_to_smem (!%p1045_p6), %s253_s14, 16, %s1123_s16, [#allocation3]  }
  0x1c   : > { %1108 = dma.done.wait (%p1197_p4), [#allocation3], 16  }
  0x1d   : > { %1110 = vsyncadd (%p1197_p4), [#allocation3], 4294967280 }
  0x1e   : > { %300 = sfence }
  0x1f   : > { %p334_p1 = scmp.lt.s32.totalorder %s1113_s27, 1  ;;  %v355_v0 = vld [vmem:[%s1270_s2] sm:$0xff]  ;;  %vm359_vm0 = vcmask 31744   ;;  %v1124_v1 = vmov 0   ;;  %vm366_vm1 = vcmask 1043456   ;;  %v356_v5 = vld [vmem:[%s1270_s2 + $0x8] sm:$0xff] }
  0x20   : > { %1011 = vmatprep.mubr.msk.f32.mxu0 %vm359_vm0, %v355_v0  ;;  %1078 = vset.pattern.permute.xlu0 %v1124_v1  ;;  %v351_v2 = vld [vmem:[%s1272_s4] sm:$0xff]  ;;  %v1125_v8 = vmov 0.0   ;;  %vm1126_vm2 = vmmov 0   ;;  %s349_s15 = sld [smem:[#allocation2]]  ;;  %vm461_vm4 = vcmask 64512   ;;  %s977_s18 = sld [smem:[#allocation2 + $0x1]] }
  0x21   : > { %s1284_s27 = smov (!%p334_p1, %s1113_s27), 1  ;;  %447 = vperm.xlu0 %1078, %v351_v2   ;;  %1079 = vset.pattern.permute.xlu1 %v1124_v1  ;;  %v352_v3 = vld [vmem:[%s1273_s5] sm:$0xff]  ;;  %vm876_vm10 = vcmask 39936  }
  0x22   : > { %s1039_s23 = smul.u32 12, %s1284_s27  ;;  %1014 = vmatprep.subr.mxu1 %v1125_v8  ;;  %1016 = vmatprep.mubr.msk.f32.mxu1 %vm1126_vm2, %v1125_v8  ;;  %v353_v9 = vld [vmem:[%s1274_s6] sm:$0xff]  ;;  %s976_s19 = sshll.u32 %s1284_s27, 3 }
  0x23   : > { %537 = vperm.xlu1 %1079, %v353_v9   ;;  %v354_v10 = vld [vmem:[%s1275_s7] sm:$0xff]  ;;  %s348_s22 = scalar_lea.vmem %s1276_s8, %s976_s19 }
  0x24   : > { %s341_s26 = scalar_lea.vmem %s1269_s1, %s1039_s23  ;;  %v357_v22 = vld [vmem:[%s1271_s3] sm:$0xff] }
  0x25   : > { %453 = vperm.xlu0 %1078, %v352_v3   ;;  %v358_v4 = vld [vmem:[%s341_s26] sm:$0xf]  ;;  %v982_v6 = vld [vmem:[%s341_s26 + $0x4] sm:$0xf]  ;;  %v987_v7 = vld [vmem:[%s341_s26 + $0x8] sm:$0xf] }
  0x26   : > { %1009 = vmatprep.subr.msk.mxu0 %vm366_vm1, %v358_v4  ;;  %v458_v16 = vstv %s349_s15  ;;  %v549_v43 = vstv %s977_s18 }
  0x27   : > { %1010 = vmatpush3.msk.msra.mxu0 %vm366_vm1, %v358_v4  ;;  %543 = vperm.xlu1 %1079, %v354_v10  }
  0x28   : > { %1012 = vmatmul.mubr.msk.f32.vlgmr.msra.gmra.mrb[0].mxu0 %vm359_vm0, %v356_v5  ;;  %1019 = vmatprep.subr.msk.mxu0 %vm366_vm1, %v982_v6 }
  0x29   : > { %1020 = vmatpush3.msk.msra.mxu0 %vm366_vm1, %v982_v6  ;;  %1021 = vmatprep.mubr.msk.f32.mxu0 %vm359_vm0, %v355_v0 }
  0x2a   : > { %1029 = vmatprep.subr.msk.mxu0 %vm366_vm1, %v987_v7 }
  0x2c   : > { %1022 = vmatmul.mubr.msk.f32.vlgmr.msra.gmra.mrb[2].mxu0 %vm359_vm0, %v356_v5 }
  0x2d   : > { %1030 = vmatpush3.msk.msra.mxu0 %vm366_vm1, %v987_v7  ;;  %1031 = vmatprep.mubr.msk.f32.mxu0 %vm359_vm0, %v355_v0 }
  0x30   : > { %1032 = vmatmul.mubr.msk.f32.vlgmr.msra.gmra.mrb[4].mxu0 %vm359_vm0, %v356_v5 }
  0xa0   : > { %v448_v11 = vpop.permute.xlu0 %447 }
  0xa2   : > { %v538_v33 = vpop.permute.xlu1 %537 }
  0xa4   : > { %v454_v15 = vpop.permute.xlu0 %453 }
  0xa6   : > { %v544_v35 = vpop.permute.xlu1 %543 }
  0xfb   : > { %v1013_v12 = vpop.f32.mrb[0].mxu0 }
  0xfc   : > { %v436_v13 = vpop.f32.mrb[1].mxu0 }
  0xfd   : > { %v450_v14 = vmul.f32 %v448_v11, %v436_v13 }
  0xff   : > { %v456_v17 = vadd.f32 %v454_v15, %v450_v14  ;;  %v1023_v18 = vpop.f32.mrb[2].mxu0 }
 0x100   : > { %v623_v19 = vpop.f32.mrb[3].mxu0 }
 0x101   : > { %v632_v20 = vmul.f32 %v623_v19, %v448_v11  ;;  %vm457_vm3 = vcmp.gt.f32.partialorder %v456_v17, 0.0  ;;  %v459_v21 = vmul.f32 %v458_v16, %v456_v17 }
 0x103   : > { %v633_v23 = vadd.f32 %v632_v20, %v454_v15  ;;  %v1033_v24 = vpop.f32.mrb[4].mxu0  ;;  %v460_v25 = vsel %vm457_vm3, %v456_v17, %v459_v21 }
 0x104   : > { %1015 = vmatpush3.msra.mxu1 %v460_v25  ;;  %v785_v26 = vpop.f32.mrb[5].mxu0 }
 0x105   : > { %v635_v27 = vmul.f32 %v633_v23, %v458_v16  ;;  %v794_v28 = vmul.f32 %v785_v26, %v448_v11  ;;  %1017 = vmatmul.mubr.msk.f32.vlgmr.msra.gmra.mrb[0].mxu1 %vm461_vm4, %v357_v22  ;;  %1024 = vmatprep.subr.mxu1 %v1125_v8  ;;  %vm634_vm5 = vcmp.gt.f32.partialorder %v633_v23, 0.0 }
 0x106   : > { %1026 = vmatprep.mubr.msk.f32.mxu1 %vm1126_vm2, %v1125_v8 }
 0x107   : > { %v795_v29 = vadd.f32 %v794_v28, %v454_v15  ;;  %v636_v30 = vsel %vm634_vm5, %v633_v23, %v635_v27 }
 0x108   : > { %1025 = vmatpush3.msra.mxu1 %v636_v30 }
 0x109   : > { %v797_v31 = vmul.f32 %v795_v29, %v458_v16  ;;  %1027 = vmatmul.mubr.msk.f32.vlgmr.msra.gmra.mrb[2].mxu1 %vm461_vm4, %v357_v22  ;;  %1034 = vmatprep.subr.mxu1 %v1125_v8  ;;  %vm796_vm6 = vcmp.gt.f32.partialorder %v795_v29, 0.0 }
 0x10a   : > { %1036 = vmatprep.mubr.msk.f32.mxu1 %vm1126_vm2, %v1125_v8 }
 0x10b   : > { %v798_v32 = vsel %vm796_vm6, %v795_v29, %v797_v31 }
 0x10c   : > { %1035 = vmatpush3.msra.mxu1 %v798_v32 }
 0x10d   : > { %1037 = vmatmul.mubr.msk.f32.vlgmr.msra.gmra.mrb[4].mxu1 %vm461_vm4, %v357_v22 }
 0x1d8   : > { %v531_v34 = vpop.f32.mrb[0].mxu1 }
 0x1d9   : > { %v540_v36 = vmul.f32 %v538_v33, %v531_v34  ;;  %v1018_v37 = vpop.f32.mrb[1].mxu1 }
 0x1db   : > { %v546_v38 = vadd.f32 %v544_v35, %v540_v36 }
 0x1dc   : > { %v703_v39 = vpop.f32.mrb[2].mxu1 }
 0x1dd   : > { %v547_v40 = vadd.f32 %v1013_v12, %v546_v38  ;;  %v707_v41 = vmul.f32 %v703_v39, %v538_v33  ;;  %v1028_v42 = vpop.f32.mrb[3].mxu1 }
 0x1df   : > { %v708_v44 = vadd.f32 %v707_v41, %v544_v35  ;;  %v550_v46 = vmul.f32 %v549_v43, %v547_v40  ;;  %vm548_vm7 = vcmp.gt.f32.partialorder %v547_v40, 0.0 }
 0x1e0   : > { %v865_v45 = vpop.f32.mrb[4].mxu1 }
 0x1e1   : > { %v709_v47 = vadd.f32 %v1023_v18, %v708_v44  ;;  %v869_v48 = vmul.f32 %v865_v45, %v538_v33  ;;  %v1038_v49 = vpop.f32.mrb[5].mxu1  ;;  %v551_v52 = vsel %vm548_vm7, %v547_v40, %v550_v46 }
 0x1e3   : > { %vm710_vm8 = vcmp.gt.f32.partialorder %v709_v47, 0.0  ;;  %v711_v50 = vmul.f32 %v709_v47, %v549_v43  ;;  %v870_v51 = vadd.f32 %v869_v48, %v544_v35 }
 0x1e5   : > { %v712_v53 = vsel %vm710_vm8, %v709_v47, %v711_v50  ;;  %v871_v54 = vadd.f32 %v1033_v24, %v870_v51 }
 0x1e6   : > { %v713_v55 = vmax.f32 %v551_v52, %v712_v53 }
 0x1e7   : > { %vm872_vm9 = vcmp.gt.f32.partialorder %v871_v54, 0.0  ;;  %v873_v56 = vmul.f32 %v871_v54, %v549_v43 }
 0x1e9   : > { %v874_v57 = vsel %vm872_vm9, %v871_v54, %v873_v56 }
 0x1ea   : > { %v875_v58 = vmax.f32 %v713_v55, %v874_v57 }
 0x1ec   : > { %877 = vst.msk [vmem:[%s348_s22] sm:$0xff] %vm876_vm10, %v875_v58 }
 0x1ed PF: > { %s19_s29 = sadd.s32 1, %s1121_s29   ;;  %s1279_s27 = smov %s1117_s28 }
 0x1ee   : > { %p16_p2 = scmp.ge.s32.totalorder %s19_s29, 4   ;;  %s1280_s28 = smov %s1282_s9 }
 0x1f0   :  { %18 = sbr.rel (!%p16_p2) target bundleno = 2 (0x2), region = 89 }
 0x1f7   :  { %903 = vsyncpa [#allocation3], 1 }
 0x1f8   :  { %905 = vsyncpa [#allocation3 + $0x1], 1 }

</bundles_post_ra>
